<compile_context>
chip_gen: v5e
topology: v5e:2x2
jax: 0.10.0
libtpu: 0.0.40
codegen_flags: <defaults>
</compile_context>

<pallas_src>
import math

import jax
import jax.numpy as jnp
from jax import lax
from jax.experimental import pallas as pl
from jax.experimental.pallas import tpu as pltpu

# ---- reference-module constants (synthetic, small) -------------------------
EPSILON = 1e-8
NETWORK_CAPACITY = 4
CHANNELS = 3
CONDITION_ON_MAPPER = True
USE_BIASES = True
LEAKY_SLOPE = 0.2


# =============================================================================
# Pallas kernel: fused modulated conv (im2col matmul), cached per-sample weight
# =============================================================================
def _make_modconv_kernel(demod: bool, apply_act: bool, has_noise: bool,
                         fuse_rgb: bool):
    """Per-(batch, HW-tile) modulated conv: (O,IKK) @ (IKK,THW) -> (O,THW)."""

    def kernel(*refs):
        it = iter(refs)
        patches_ref = next(it)                       # (1, IKK, THW) bf16
        weight_ref = next(it)                        # (O, IKK)      bf16
        style_ref = next(it)                         # (1, 1, IKK)   f32 (style+1)
        noise_ref = nscale_ref = nbias_ref = None
        if has_noise:
            noise_ref = next(it)                     # (1, 1, THW)   f32
            nscale_ref = next(it)                    # (O, 1)        f32
            nbias_ref = next(it)                     # (O, 1)        f32
        rgbw_ref = rgbstyle_ref = None
        if fuse_rgb:
            rgbw_ref = next(it)                      # (R, O)        f32
            rgbstyle_ref = next(it)                  # (1, 1, O)     f32 (style+1)
        out_ref = next(it)                           # (1, O, THW)
        rgb_out_ref = next(it) if fuse_rgb else None  # (1, R, THW)   f32
        wmod_ref = next(it)                          # scratch (O, IKK) bf16

        # Per-sample modulation + demod hoisted out of the HW-tile loop.  Only
        # the first HW tile of each batch element recomputes the modulated bf16
        # weight; later tiles reuse the VMEM cache.  Legal because the HW grid
        # axis is "arbitrary" (sequential on a core).
        @pl.when(pl.program_id(1) == 0)
        def _():
            w = weight_ref[...].astype(jnp.float32) * style_ref[0]      # (O, IKK)
            if demod:
                d = lax.rsqrt(jnp.sum(w * w, axis=1, keepdims=True) + EPSILON)
                w = w * d
            wmod_ref[...] = w.astype(jnp.bfloat16)

        # bf16 MXU matmul, f32 accumulate.
        acc = jnp.dot(wmod_ref[...], patches_ref[0],
                      preferred_element_type=jnp.float32)               # (O, THW)
        if has_noise:
            # noise_ref[0]: (1, THW) spatial map; nscale/nbias: (O, 1) per-chan.
            acc = acc + nscale_ref[...] * noise_ref[0] + nbias_ref[...]
        if apply_act:
            acc = jnp.where(acc >= 0.0, acc, LEAKY_SLOPE * acc)
        act = acc.astype(out_ref.dtype)
        out_ref[0] = act

        if fuse_rgb:
            # Fused 1x1 RGB mod-conv (no demod, no noise, no act) on the
            # already-resident activated tile: (R,O) @ (O,THW).
            rgbw = (rgbw_ref[...].astype(jnp.float32)
                    * rgbstyle_ref[0]).astype(jnp.bfloat16)
            rgb_out_ref[0] = jnp.dot(rgbw, act.astype(jnp.bfloat16),
                                     preferred_element_type=jnp.float32)

    return kernel


def _tpu_vmem_bytes():
    """Per-core VMEM capacity (generation-aware), conservative fallback = 64MiB."""
    try:
        cap = int(pltpu.get_tpu_info().vmem_capacity_bytes)
        if cap > 0:
            return cap
    except Exception:
        pass
    return 64 * 1024 * 1024  # v7x-sized conservative default


def _pick_hw_tile(HW, IKK, O, out_bytes, fuse_rgb, vmem_cap):
    """Largest multiple-of-128 HW tile fitting the streamed+resident VMEM budget."""
    # Streamed per HW column (double-buffered): patches bf16 + x out + noise f32
    # (+ rgb out f32), plus the live f32 accumulator (O rows).
    per_col = 2 * (IKK * 2 + O * out_bytes + 4 + (3 * 4 if fuse_rgb else 0)) + O * 4
    # Resident: weight bf16 (double-buffered), style/nscale/nbias, wmod scratch,
    # plus headroom for Mosaic internal scratch.
    fixed = (2 * (O * IKK * 2 + IKK * 4 + 2 * O * 4)
             + O * IKK * 2 + 4 * 1024 * 1024)
    budget = int(vmem_cap * 0.45) - fixed
    t = max(budget // per_col, 0) // 128 * 128
    if t <= 0:
        t = 128
    if t >= HW:
        return HW
    while HW % t != 0 and t > 128:
        t -= 128
    return t if HW % t == 0 else HW


def _im2col(x, k, pad):
    """(B,C,H,W) -> (B, C*k*k, H*W) in (c, kh, kw)-major order (stride=dil=1)."""
    B, C, H, W = x.shape
    if k == 1:
        return x.reshape(B, C, H * W)
    xp = jnp.pad(x, ((0, 0), (0, 0), (pad, pad), (pad, pad)))
    return jnp.stack(
        [xp[:, :, kh:kh + H, kw:kw + W] for kh in range(k) for kw in range(k)],
        axis=2,
    ).reshape(B, C * k * k, H * W)


def _modconv_xla(x, weight, style, noise, demod, apply_act, rgb, out_dtype):
    """Plain-XLA reference path for tiny / lane-unfriendly spatial maps."""
    B, C, H, W = x.shape
    O, _, k, _ = weight.shape
    HW = H * W
    pad = (k - 1) // 2
    w = weight[None].astype(jnp.float32) * (style.astype(jnp.float32) + 1.0)[:, None, :, None, None]
    if demod:
        d = lax.rsqrt(jnp.sum(w * w, axis=(2, 3, 4), keepdims=True) + EPSILON)
        w = w * d
    patches = _im2col(x.astype(jnp.float32), k, pad)                     # (B, IKK, HW)
    out = jnp.einsum('boi,bih->boh', w.reshape(B, O, C * k * k), patches)
    if noise is not None:
        noise_map, w_noise, b_noise = noise
        out = out + w_noise[None, :, None] * noise_map + b_noise[None, :, None]
    if apply_act:
        out = jnp.where(out >= 0.0, out, LEAKY_SLOPE * out)
    x_out = out.astype(out_dtype).reshape(B, O, H, W)
    if rgb is None:
        return x_out
    rgb_w, rgb_style = rgb                                               # (R, O), (B, O)
    rgbw = rgb_w[None].astype(jnp.float32) * (rgb_style.astype(jnp.float32) + 1.0)[:, None, :]
    rgb_out = jnp.einsum('bro,boh->brh', rgbw, out).reshape(B, rgb_w.shape[0], H, W)
    return x_out, rgb_out


def modconv2d(x, weight, style, noise=None, demod=True, apply_act=False,
              rgb=None, out_dtype=jnp.float32):
    """Conv2DMod forward (stride=1, dilation=1, 'same' padding), fused epilogue.

    x: (B, Cin, H, W)   weight: (Cout, Cin, k, k) f32   style: (B, Cin) f32
    noise: None or (noise_map (B, 1, H*W) f32, w_noise (Cout,), b_noise (Cout,))
    rgb:   None or (rgb_weight (R, Cout) f32, rgb_style (B, Cout) f32) -> fused
           1x1 RGB mod-conv (no demod/noise/act) as a second f32 output.
    Returns (B, Cout, H, W) [, (B, R, H, W)].
    """
    B, C, H, W = x.shape
    O, _, k, _ = weight.shape
    HW = H * W
    IKK = C * k * k
    pad = (k - 1) // 2
    has_noise = noise is not None
    fuse_rgb = rgb is not None

    # Sub-lane / tiny spatial maps: per-step + launch overhead dominates and the
    # output lane dim would be masked -> plain XLA is faster (perf review).
    if HW < 128 or HW % 128 != 0:
        return _modconv_xla(x, weight, style, noise, demod, apply_act, rgb, out_dtype)

    patches = _im2col(x, k, pad).astype(jnp.bfloat16)
    weight_b = weight.reshape(O, IKK).astype(jnp.bfloat16)               # (O, IKK)
    style_row = jnp.repeat(style.astype(jnp.float32) + 1.0, k * k,
                           axis=1).reshape(B, 1, IKK)                    # lane-major

    out_bytes = jnp.dtype(out_dtype).itemsize
    vmem_cap = _tpu_vmem_bytes()
    THW = _pick_hw_tile(HW, IKK, O, out_bytes, fuse_rgb, vmem_cap)
    grid = (B, HW // THW)

    in_specs = [
        pl.BlockSpec((1, IKK, THW), lambda b, t: (b, 0, t)),
        pl.BlockSpec((O, IKK), lambda b, t: (0, 0)),      # resident across grid
        pl.BlockSpec((1, 1, IKK), lambda b, t: (b, 0, 0)),
    ]
    args = [patches, weight_b, style_row]
    if has_noise:
        noise_map, w_noise, b_noise = noise
        in_specs += [
            pl.BlockSpec((1, 1, THW), lambda b, t: (b, 0, t)),
            pl.BlockSpec((O, 1), lambda b, t: (0, 0)),
            pl.BlockSpec((O, 1), lambda b, t: (0, 0)),
        ]
        args += [noise_map.astype(jnp.float32),
                 w_noise.reshape(O, 1).astype(jnp.float32),
                 b_noise.reshape(O, 1).astype(jnp.float32)]

    out_shapes = [jax.ShapeDtypeStruct((B, O, HW), out_dtype)]
    out_specs = [pl.BlockSpec((1, O, THW), lambda b, t: (b, 0, t))]
    if fuse_rgb:
        rgb_w, rgb_style = rgb
        R = rgb_w.shape[0]
        in_specs += [
            pl.BlockSpec((R, O), lambda b, t: (0, 0)),
            pl.BlockSpec((1, 1, O), lambda b, t: (b, 0, 0)),
        ]
        args += [rgb_w.astype(jnp.float32),
                 (rgb_style.astype(jnp.float32) + 1.0).reshape(B, 1, O)]
        out_shapes.append(jax.ShapeDtypeStruct((B, R, HW), jnp.float32))
        out_specs.append(pl.BlockSpec((1, R, THW), lambda b, t: (b, 0, t)))

    outs = pl.pallas_call(
        _make_modconv_kernel(demod, apply_act, has_noise, fuse_rgb),
        out_shape=tuple(out_shapes) if fuse_rgb else out_shapes[0],
        grid=grid,
        in_specs=in_specs,
        out_specs=tuple(out_specs) if fuse_rgb else out_specs[0],
        scratch_shapes=[pltpu.VMEM((O, IKK), jnp.bfloat16)],   # per-sample wmod cache
        compiler_params=pltpu.CompilerParams(
            # Batch axis megacore-parallel; HW axis sequential so the cached
            # modulated weight is valid across its tiles (perf review).
            dimension_semantics=("parallel", "arbitrary"),
            vmem_limit_bytes=int(vmem_cap * 0.75),
        ),
    )(*args)

    if fuse_rgb:
        x_out, rgb_out = outs
        return x_out.reshape(B, O, H, W), rgb_out.reshape(B, R, H, W)
    return outs.reshape(B, O, H, W)


# =============================================================================
# JAX glue (upsampling, parameter setup)
# =============================================================================
def _upsample_axis2x(x, axis):
    """2x linear upsample (align_corners=False) along `axis` via 0.25/0.75 taps."""
    n = x.shape[axis]
    x_prev = jnp.concatenate([lax.slice_in_dim(x, 0, 1, axis=axis),
                              lax.slice_in_dim(x, 0, n - 1, axis=axis)], axis=axis)
    x_next = jnp.concatenate([lax.slice_in_dim(x, 1, n, axis=axis),
                              lax.slice_in_dim(x, n - 1, n, axis=axis)], axis=axis)
    even = 0.25 * x_prev + 0.75 * x        # output index 2i
    odd = 0.75 * x + 0.25 * x_next         # output index 2i+1
    out = jnp.stack([even, odd], axis=axis + 1)
    new_shape = x.shape[:axis] + (2 * n,) + x.shape[axis + 1:]
    return out.reshape(new_shape)


def upsample2x(x):
    """Bilinear 2x upsample, align_corners=False (PyTorch nn.Upsample). NCHW."""
    return _upsample_axis2x(_upsample_axis2x(x, 2), 3)


class _KeyGen:
    def __init__(self, key):
        self.key = key

    def __call__(self):
        self.key, sub = jax.random.split(self.key)
        return sub


def _init_linear(kg, din, dout):
    bound = 1.0 / math.sqrt(din)
    w = jax.random.uniform(kg(), (din, dout), jnp.float32, -bound, bound)
    b = jax.random.uniform(kg(), (1, dout), jnp.float32, -bound, bound)
    return w, b


def _init_conv_mod(kg, out_c, in_c, k):
    fan_in = in_c * k * k
    std = math.sqrt(2.0 / fan_in)  # kaiming_normal_, fan_in, leaky_relu a=0
    return std * jax.random.normal(kg(), (out_c, in_c, k, k), jnp.float32)


def init_generator(kg, image_size, latent_dim,
                   network_capacity=NETWORK_CAPACITY, channels=CHANNELS):
    num_layers = int(math.log2(image_size) - 1)
    init_channels = 4 * network_capacity
    filters = [init_channels] + [network_capacity * 2 ** (i + 1)
                                 for i in range(num_layers)][::-1]
    params = {
        "initial_block": jax.random.normal(kg(), (init_channels, 4, 4), jnp.float32),
        "blocks": [],
    }
    for ind, (in_chan, out_chan) in enumerate(zip(filters[:-1], filters[1:])):
        blk = {}
        blk["upsample"] = ind != 0
        blk["upsample_rgb"] = ind != num_layers - 1
        blk["to_style1_w"], blk["to_style1_b"] = _init_linear(kg, latent_dim, in_chan)
        blk["to_noise1_w"] = jax.random.uniform(kg(), (out_chan,), jnp.float32, -1.0, 1.0)
        blk["to_noise1_b"] = jax.random.uniform(kg(), (out_chan,), jnp.float32, -1.0, 1.0)
        blk["conv1_w"] = _init_conv_mod(kg, out_chan, in_chan, 3)
        blk["to_style2_w"], blk["to_style2_b"] = _init_linear(kg, latent_dim, out_chan)
        blk["to_noise2_w"] = jax.random.uniform(kg(), (out_chan,), jnp.float32, -1.0, 1.0)
        blk["to_noise2_b"] = jax.random.uniform(kg(), (out_chan,), jnp.float32, -1.0, 1.0)
        blk["conv2_w"] = _init_conv_mod(kg, out_chan, out_chan, 3)
        blk["rgb_style_w"], blk["rgb_style_b"] = _init_linear(kg, latent_dim, out_chan)
        blk["rgb_conv_w"] = _init_conv_mod(kg, channels, out_chan, 1)
        params["blocks"].append(blk)
    return params


# =============================================================================
# Forward pass (mirrors the PyTorch reference)
# =============================================================================
def generator_block_forward(p, x, prev_rgb, istyle, inoise):
    if p["upsample"]:
        x = upsample2x(x)
    B, C, H, W = x.shape
    HW = H * W

    # Reference applies Linear(1, filters) then permute(0,3,2,1): at output pixel
    # (h, w), noise = inoise[b, w, h] * w_noise[o] + b_noise[o].  (Valid because
    # H == W, exactly as in the reference.)  Only the (B, 1, HW) spatial map goes
    # to HBM; the per-channel scale/bias is applied inside the kernel.
    noise_map = jnp.transpose(inoise[:, :H, :W, 0], (0, 2, 1)).reshape(B, 1, HW)

    # Tiny style projections: plain XLA GEMMs (Pallas launch overhead not worth it).
    style1 = istyle @ p["to_style1_w"] + p["to_style1_b"]
    x = modconv2d(x, p["conv1_w"], style1,
                  noise=(noise_map, p["to_noise1_w"], p["to_noise1_b"]),
                  demod=True, apply_act=True, out_dtype=jnp.bfloat16)

    style2 = istyle @ p["to_style2_w"] + p["to_style2_b"]
    rgb_style = istyle @ p["rgb_style_w"] + p["rgb_style_b"]
    # conv2 with the 1x1 RGB mod-conv (no demod/noise/act) fused into its epilogue.
    x, rgb_new = modconv2d(x, p["conv2_w"], style2,
                           noise=(noise_map, p["to_noise2_w"], p["to_noise2_b"]),
                           demod=True, apply_act=True, out_dtype=jnp.bfloat16,
                           rgb=(p["rgb_conv_w"].reshape(CHANNELS, -1), rgb_style))

    rgb = rgb_new if prev_rgb is None else rgb_new + prev_rgb
    if p["upsample_rgb"]:
        rgb = upsample2x(rgb)
    return x, rgb


def generator_forward(params, styles, input_noise, labels):
    B = styles.shape[0]
    init = params["initial_block"]
    x = jnp.broadcast_to(init[None], (B,) + init.shape)
    styles_t = jnp.transpose(styles, (1, 0, 2))  # (num_layers, B, latent)
    rgb = None
    for li, blk in enumerate(params["blocks"]):
        style = styles_t[li]
        if not CONDITION_ON_MAPPER:
            style = jnp.concatenate([style, labels], axis=1)
        x, rgb = generator_block_forward(blk, x, rgb, style, input_noise)
    return rgb


# =============================================================================
if __name__ == "__main__":
    image_size = 16
    latent_dim = 32
    label_dim = 4
    batch = 2
    num_layers = int(math.log2(image_size) - 1)  # 3

    kg = _KeyGen(jax.random.PRNGKey(0))
    params = init_generator(kg, image_size, latent_dim)

    k1, k2, k3 = jax.random.split(jax.random.PRNGKey(0), 3)
    styles = jax.random.normal(k1, (batch, num_layers, latent_dim), jnp.float32)
    input_noise = jax.random.uniform(k2, (batch, image_size, image_size, 1), jnp.float32)
    labels = jax.random.normal(k3, (batch, label_dim), jnp.float32)  # unused (CONDITION_ON_MAPPER)

    fwd = jax.jit(lambda s, n, l: generator_forward(params, s, n, l))
    rgb = fwd(styles, input_noise, labels)
    jax.block_until_ready(rgb)

    assert rgb.shape == (batch, CHANNELS, image_size, image_size), rgb.shape
    assert rgb.dtype == jnp.float32
    assert bool(jnp.all(jnp.isfinite(rgb)))
    print("KERNEL_OK")
</pallas_src>

<mosaic_0001>
module attributes {stable_mosaic.version = 11 : i64} {
  func.func @kernel(%arg0: i32, %arg1: i32, %arg2: memref<1x144x256xbf16, #tpu.memory_space<vmem>>, %arg3: memref<8x144xbf16, #tpu.memory_space<vmem>>, %arg4: memref<1x1x144xf32, #tpu.memory_space<vmem>>, %arg5: memref<1x1x256xf32, #tpu.memory_space<vmem>>, %arg6: memref<8x1xf32, #tpu.memory_space<vmem>>, %arg7: memref<8x1xf32, #tpu.memory_space<vmem>>, %arg8: memref<1x8x256xbf16, #tpu.memory_space<vmem>>, %arg9: memref<8x144xbf16, #tpu.memory_space<vmem>>) attributes {dimension_semantics = [#tpu.dimension_semantics<parallel>, #tpu.dimension_semantics<arbitrary>], iteration_bounds = array<i64: 2, 1>, scalar_prefetch = 0 : i64, scratch_operands = 1 : i64, tpu.core_type = #tpu.core_type<tc>, window_params = [{transform_indices = @transform_0, window_bounds = array<i64: 1, 144, 256>}, {pipeline_mode = #tpu.pipeline_mode<synchronous>, transform_indices = @transform_1, window_bounds = array<i64: 8, 144>}, {transform_indices = @transform_2, window_bounds = array<i64: 1, 1, 144>}, {transform_indices = @transform_3, window_bounds = array<i64: 1, 1, 256>}, {pipeline_mode = #tpu.pipeline_mode<synchronous>, transform_indices = @transform_4, window_bounds = array<i64: 8, 1>}, {pipeline_mode = #tpu.pipeline_mode<synchronous>, transform_indices = @transform_5, window_bounds = array<i64: 8, 1>}, {transform_indices = @transform_6, window_bounds = array<i64: 1, 8, 256>}]} {
    %c0_i32 = arith.constant 0 : i32
    %0 = arith.cmpi eq, %arg1, %c0_i32 : i32
    %1 = arith.extui %0 : i1 to i32
    %c0_i32_0 = arith.constant 0 : i32
    %2 = arith.cmpi ne, %1, %c0_i32_0 : i32
    scf.if %2 {
      %c0_17 = arith.constant 0 : index
      %c0_18 = arith.constant 0 : index
      %26 = vector.load %arg3[%c0_17, %c0_18] : memref<8x144xbf16, #tpu.memory_space<vmem>>, vector<8x144xbf16>
      %27 = arith.extf %26 : vector<8x144xbf16> to vector<8x144xf32>
      %c0_19 = arith.constant 0 : index
      %c0_20 = arith.constant 0 : index
      %c0_21 = arith.constant 0 : index
      %28 = vector.load %arg4[%c0_19, %c0_20, %c0_21] : memref<1x1x144xf32, #tpu.memory_space<vmem>>, vector<1x1x144xf32>
      %29 = vector.shape_cast %28 : vector<1x1x144xf32> to vector<1x144xf32>
      %30 = vector.broadcast %29 : vector<1x144xf32> to vector<8x144xf32>
      %31 = arith.mulf %27, %30 : vector<8x144xf32>
      %32 = arith.mulf %31, %31 : vector<8x144xf32>
      %cst_22 = arith.constant dense<0.000000e+00> : vector<8xf32>
      %33 = vector.multi_reduction <add>, %32, %cst_22 [1] : vector<8x144xf32> to vector<8xf32>
      %34 = vector.shape_cast %33 : vector<8xf32> to vector<8x1xf32>
      %cst_23 = arith.constant 9.99999993E-9 : f32
      %35 = vector.broadcast %cst_23 : f32 to vector<8x1xf32>
      %36 = arith.addf %34, %35 : vector<8x1xf32>
      %37 = math.rsqrt %36 : vector<8x1xf32>
      %38 = vector.broadcast %37 : vector<8x1xf32> to vector<8x144xf32>
      %39 = arith.mulf %31, %38 : vector<8x144xf32>
      %40 = arith.truncf %39 : vector<8x144xf32> to vector<8x144xbf16>
      %c0_24 = arith.constant 0 : index
      %c0_25 = arith.constant 0 : index
      %41 = vector.load %arg9[%c0_24, %c0_25] : memref<8x144xbf16, #tpu.memory_space<vmem>>, vector<8x144xbf16>
      tpu.vector_store %arg9[%c0_24, %c0_25], %40 {strides = array<i32>} : memref<8x144xbf16, #tpu.memory_space<vmem>>, vector<8x144xbf16>,
    } else {
    }
    %c0 = arith.constant 0 : index
    %c0_1 = arith.constant 0 : index
    %3 = vector.load %arg9[%c0, %c0_1] : memref<8x144xbf16, #tpu.memory_space<vmem>>, vector<8x144xbf16>
    %c0_2 = arith.constant 0 : index
    %c0_3 = arith.constant 0 : index
    %c0_4 = arith.constant 0 : index
    %4 = vector.load %arg2[%c0_2, %c0_3, %c0_4] : memref<1x144x256xbf16, #tpu.memory_space<vmem>>, vector<1x144x256xbf16>
    %5 = vector.shape_cast %4 : vector<1x144x256xbf16> to vector<144x256xbf16>
    %cst = arith.constant dense<0.000000e+00> : vector<8x256xf32>
    %6 = tpu.matmul %3, %5, %cst {dimension_numbers = #tpu.dot_dimension_numbers<[1], [0], [0], [1], [0, 0, 1, 1], [], []>} : vector<8x144xbf16>, vector<144x256xbf16>, vector<8x256xf32> -> vector<8x256xf32>
    %c0_5 = arith.constant 0 : index
    %c0_6 = arith.constant 0 : index
    %7 = vector.load %arg6[%c0_5, %c0_6] : memref<8x1xf32, #tpu.memory_space<vmem>>, vector<8x1xf32>
    %c0_7 = arith.constant 0 : index
    %c0_8 = arith.constant 0 : index
    %c0_9 = arith.constant 0 : index
    %8 = vector.load %arg5[%c0_7, %c0_8, %c0_9] : memref<1x1x256xf32, #tpu.memory_space<vmem>>, vector<1x1x256xf32>
    %9 = vector.shape_cast %8 : vector<1x1x256xf32> to vector<1x256xf32>
    %10 = vector.broadcast %7 : vector<8x1xf32> to vector<8x256xf32>
    %11 = vector.broadcast %9 : vector<1x256xf32> to vector<8x256xf32>
    %12 = arith.mulf %10, %11 : vector<8x256xf32>
    %13 = arith.addf %6, %12 : vector<8x256xf32>
    %c0_10 = arith.constant 0 : index
    %c0_11 = arith.constant 0 : index
    %14 = vector.load %arg7[%c0_10, %c0_11] : memref<8x1xf32, #tpu.memory_space<vmem>>, vector<8x1xf32>
    %15 = vector.broadcast %14 : vector<8x1xf32> to vector<8x256xf32>
    %16 = arith.addf %13, %15 : vector<8x256xf32>
    %cst_12 = arith.constant 0.000000e+00 : f32
    %17 = vector.broadcast %cst_12 : f32 to vector<8x256xf32>
    %18 = arith.cmpf oge, %16, %17 : vector<8x256xf32>
    %cst_13 = arith.constant 2.000000e-01 : f32
    %19 = vector.broadcast %cst_13 : f32 to vector<8x256xf32>
    %20 = arith.mulf %19, %16 : vector<8x256xf32>
    %21 = arith.select %18, %16, %20 : vector<8x256xi1>, vector<8x256xf32>
    %22 = arith.truncf %21 : vector<8x256xf32> to vector<8x256xbf16>
    %c0_14 = arith.constant 0 : index
    %c0_15 = arith.constant 0 : index
    %c0_16 = arith.constant 0 : index
    %23 = vector.load %arg8[%c0_14, %c0_15, %c0_16] : memref<1x8x256xbf16, #tpu.memory_space<vmem>>, vector<1x8x256xbf16>
    %24 = vector.shape_cast %23 : vector<1x8x256xbf16> to vector<8x256xbf16>
    %25 = vector.shape_cast %22 : vector<8x256xbf16> to vector<1x8x256xbf16>
    tpu.vector_store %arg8[%c0_14, %c0_15, %c0_16], %25 {strides = array<i32>} : memref<1x8x256xbf16, #tpu.memory_space<vmem>>, vector<1x8x256xbf16>,
    return
  }
  func.func @transform_0(%arg0: i32, %arg1: i32) -> (i32, i32, i32) {
    %c0_i32 = arith.constant 0 : i32
    %c0_i32_0 = arith.constant 0 : i32
    return %arg0, %c0_i32, %arg1 : i32, i32, i32
  }
  func.func @transform_1(%arg0: i32, %arg1: i32) -> (i32, i32) {
    %c0_i32 = arith.constant 0 : i32
    %c0_i32_0 = arith.constant 0 : i32
    %c0_i32_1 = arith.constant 0 : i32
    return %c0_i32, %c0_i32_0 : i32, i32
  }
  func.func @transform_2(%arg0: i32, %arg1: i32) -> (i32, i32, i32) {
    %c0_i32 = arith.constant 0 : i32
    %c0_i32_0 = arith.constant 0 : i32
    %c0_i32_1 = arith.constant 0 : i32
    return %arg0, %c0_i32, %c0_i32_0 : i32, i32, i32
  }
  func.func @transform_3(%arg0: i32, %arg1: i32) -> (i32, i32, i32) {
    %c0_i32 = arith.constant 0 : i32
    %c0_i32_0 = arith.constant 0 : i32
    return %arg0, %c0_i32, %arg1 : i32, i32, i32
  }
  func.func @transform_4(%arg0: i32, %arg1: i32) -> (i32, i32) {
    %c0_i32 = arith.constant 0 : i32
    %c0_i32_0 = arith.constant 0 : i32
    %c0_i32_1 = arith.constant 0 : i32
    return %c0_i32, %c0_i32_0 : i32, i32
  }
  func.func @transform_5(%arg0: i32, %arg1: i32) -> (i32, i32) {
    %c0_i32 = arith.constant 0 : i32
    %c0_i32_0 = arith.constant 0 : i32
    %c0_i32_1 = arith.constant 0 : i32
    return %c0_i32, %c0_i32_0 : i32, i32
  }
  func.func @transform_6(%arg0: i32, %arg1: i32) -> (i32, i32, i32) {
    %c0_i32 = arith.constant 0 : i32
    %c0_i32_0 = arith.constant 0 : i32
    return %arg0, %c0_i32, %arg1 : i32, i32, i32
  }
}

module attributes {stable_mosaic.version = 11 : i64} {
  func.func @kernel(%arg0: i32, %arg1: i32, %arg2: memref<1x72x256xbf16, #tpu.memory_space<vmem>>, %arg3: memref<8x72xbf16, #tpu.memory_space<vmem>>, %arg4: memref<1x1x72xf32, #tpu.memory_space<vmem>>, %arg5: memref<1x1x256xf32, #tpu.memory_space<vmem>>, %arg6: memref<8x1xf32, #tpu.memory_space<vmem>>, %arg7: memref<8x1xf32, #tpu.memory_space<vmem>>, %arg8: memref<3x8xf32, #tpu.memory_space<vmem>>, %arg9: memref<1x1x8xf32, #tpu.memory_space<vmem>>, %arg10: memref<1x8x256xbf16, #tpu.memory_space<vmem>>, %arg11: memref<1x3x256xf32, #tpu.memory_space<vmem>>, %arg12: memref<8x72xbf16, #tpu.memory_space<vmem>>) attributes {dimension_semantics = [#tpu.dimension_semantics<parallel>, #tpu.dimension_semantics<arbitrary>], iteration_bounds = array<i64: 2, 1>, scalar_prefetch = 0 : i64, scratch_operands = 1 : i64, tpu.core_type = #tpu.core_type<tc>, window_params = [{transform_indices = @transform_0, window_bounds = array<i64: 1, 72, 256>}, {pipeline_mode = #tpu.pipeline_mode<synchronous>, transform_indices = @transform_1, window_bounds = array<i64: 8, 72>}, {transform_indices = @transform_2, window_bounds = array<i64: 1, 1, 72>}, {transform_indices = @transform_3, window_bounds = array<i64: 1, 1, 256>}, {pipeline_mode = #tpu.pipeline_mode<synchronous>, transform_indices = @transform_4, window_bounds = array<i64: 8, 1>}, {pipeline_mode = #tpu.pipeline_mode<synchronous>, transform_indices = @transform_5, window_bounds = array<i64: 8, 1>}, {pipeline_mode = #tpu.pipeline_mode<synchronous>, transform_indices = @transform_6, window_bounds = array<i64: 3, 8>}, {transform_indices = @transform_7, window_bounds = array<i64: 1, 1, 8>}, {transform_indices = @transform_8, window_bounds = array<i64: 1, 8, 256>}, {transform_indices = @transform_9, window_bounds = array<i64: 1, 3, 256>}]} {
    %c0_i32 = arith.constant 0 : i32
    %0 = arith.cmpi eq, %arg1, %c0_i32 : i32
    %1 = arith.extui %0 : i1 to i32
    %c0_i32_0 = arith.constant 0 : i32
    %2 = arith.cmpi ne, %1, %c0_i32_0 : i32
    scf.if %2 {
      %c0_26 = arith.constant 0 : index
      %c0_27 = arith.constant 0 : index
      %36 = vector.load %arg3[%c0_26, %c0_27] : memref<8x72xbf16, #tpu.memory_space<vmem>>, vector<8x72xbf16>
      %37 = arith.extf %36 : vector<8x72xbf16> to vector<8x72xf32>
      %c0_28 = arith.constant 0 : index
      %c0_29 = arith.constant 0 : index
      %c0_30 = arith.constant 0 : index
      %38 = vector.load %arg4[%c0_28, %c0_29, %c0_30] : memref<1x1x72xf32, #tpu.memory_space<vmem>>, vector<1x1x72xf32>
      %39 = vector.shape_cast %38 : vector<1x1x72xf32> to vector<1x72xf32>
      %40 = vector.broadcast %39 : vector<1x72xf32> to vector<8x72xf32>
      %41 = arith.mulf %37, %40 : vector<8x72xf32>
      %42 = arith.mulf %41, %41 : vector<8x72xf32>
      %cst_31 = arith.constant dense<0.000000e+00> : vector<8xf32>
      %43 = vector.multi_reduction <add>, %42, %cst_31 [1] : vector<8x72xf32> to vector<8xf32>
      %44 = vector.shape_cast %43 : vector<8xf32> to vector<8x1xf32>
      %cst_32 = arith.constant 9.99999993E-9 : f32
      %45 = vector.broadcast %cst_32 : f32 to vector<8x1xf32>
      %46 = arith.addf %44, %45 : vector<8x1xf32>
      %47 = math.rsqrt %46 : vector<8x1xf32>
      %48 = vector.broadcast %47 : vector<8x1xf32> to vector<8x72xf32>
      %49 = arith.mulf %41, %48 : vector<8x72xf32>
      %50 = arith.truncf %49 : vector<8x72xf32> to vector<8x72xbf16>
      %c0_33 = arith.constant 0 : index
      %c0_34 = arith.constant 0 : index
      %51 = vector.load %arg12[%c0_33, %c0_34] : memref<8x72xbf16, #tpu.memory_space<vmem>>, vector<8x72xbf16>
      tpu.vector_store %arg12[%c0_33, %c0_34], %50 {strides = array<i32>} : memref<8x72xbf16, #tpu.memory_space<vmem>>, vector<8x72xbf16>,
    } else {
    }
    %c0 = arith.constant 0 : index
    %c0_1 = arith.constant 0 : index
    %3 = vector.load %arg12[%c0, %c0_1] : memref<8x72xbf16, #tpu.memory_space<vmem>>, vector<8x72xbf16>
    %c0_2 = arith.constant 0 : index
    %c0_3 = arith.constant 0 : index
    %c0_4 = arith.constant 0 : index
    %4 = vector.load %arg2[%c0_2, %c0_3, %c0_4] : memref<1x72x256xbf16, #tpu.memory_space<vmem>>, vector<1x72x256xbf16>
    %5 = vector.shape_cast %4 : vector<1x72x256xbf16> to vector<72x256xbf16>
    %cst = arith.constant dense<0.000000e+00> : vector<8x256xf32>
    %6 = tpu.matmul %3, %5, %cst {dimension_numbers = #tpu.dot_dimension_numbers<[1], [0], [0], [1], [0, 0, 1, 1], [], []>} : vector<8x72xbf16>, vector<72x256xbf16>, vector<8x256xf32> -> vector<8x256xf32>
    %c0_5 = arith.constant 0 : index
    %c0_6 = arith.constant 0 : index
    %7 = vector.load %arg6[%c0_5, %c0_6] : memref<8x1xf32, #tpu.memory_space<vmem>>, vector<8x1xf32>
    %c0_7 = arith.constant 0 : index
    %c0_8 = arith.constant 0 : index
    %c0_9 = arith.constant 0 : index
    %8 = vector.load %arg5[%c0_7, %c0_8, %c0_9] : memref<1x1x256xf32, #tpu.memory_space<vmem>>, vector<1x1x256xf32>
    %9 = vector.shape_cast %8 : vector<1x1x256xf32> to vector<1x256xf32>
    %10 = vector.broadcast %7 : vector<8x1xf32> to vector<8x256xf32>
    %11 = vector.broadcast %9 : vector<1x256xf32> to vector<8x256xf32>
    %12 = arith.mulf %10, %11 : vector<8x256xf32>
    %13 = arith.addf %6, %12 : vector<8x256xf32>
    %c0_10 = arith.constant 0 : index
    %c0_11 = arith.constant 0 : index
    %14 = vector.load %arg7[%c0_10, %c0_11] : memref<8x1xf32, #tpu.memory_space<vmem>>, vector<8x1xf32>
    %15 = vector.broadcast %14 : vector<8x1xf32> to vector<8x256xf32>
    %16 = arith.addf %13, %15 : vector<8x256xf32>
    %cst_12 = arith.constant 0.000000e+00 : f32
    %17 = vector.broadcast %cst_12 : f32 to vector<8x256xf32>
    %18 = arith.cmpf oge, %16, %17 : vector<8x256xf32>
    %cst_13 = arith.constant 2.000000e-01 : f32
    %19 = vector.broadcast %cst_13 : f32 to vector<8x256xf32>
    %20 = arith.mulf %19, %16 : vector<8x256xf32>
    %21 = arith.select %18, %16, %20 : vector<8x256xi1>, vector<8x256xf32>
    %22 = arith.truncf %21 : vector<8x256xf32> to vector<8x256xbf16>
    %c0_14 = arith.constant 0 : index
    %c0_15 = arith.constant 0 : index
    %c0_16 = arith.constant 0 : index
    %23 = vector.load %arg10[%c0_14, %c0_15, %c0_16] : memref<1x8x256xbf16, #tpu.memory_space<vmem>>, vector<1x8x256xbf16>
    %24 = vector.shape_cast %23 : vector<1x8x256xbf16> to vector<8x256xbf16>
    %25 = vector.shape_cast %22 : vector<8x256xbf16> to vector<1x8x256xbf16>
    tpu.vector_store %arg10[%c0_14, %c0_15, %c0_16], %25 {strides = array<i32>} : memref<1x8x256xbf16, #tpu.memory_space<vmem>>, vector<1x8x256xbf16>,
    %c0_17 = arith.constant 0 : index
    %c0_18 = arith.constant 0 : index
    %26 = vector.load %arg8[%c0_17, %c0_18] : memref<3x8xf32, #tpu.memory_space<vmem>>, vector<3x8xf32>
    %c0_19 = arith.constant 0 : index
    %c0_20 = arith.constant 0 : index
    %c0_21 = arith.constant 0 : index
    %27 = vector.load %arg9[%c0_19, %c0_20, %c0_21] : memref<1x1x8xf32, #tpu.memory_space<vmem>>, vector<1x1x8xf32>
    %28 = vector.shape_cast %27 : vector<1x1x8xf32> to vector<1x8xf32>
    %29 = vector.broadcast %28 : vector<1x8xf32> to vector<3x8xf32>
    %30 = arith.mulf %26, %29 : vector<3x8xf32>
    %31 = arith.truncf %30 : vector<3x8xf32> to vector<3x8xbf16>
    %cst_22 = arith.constant dense<0.000000e+00> : vector<3x256xf32>
    %32 = tpu.matmul %31, %22, %cst_22 {dimension_numbers = #tpu.dot_dimension_numbers<[1], [0], [0], [1], [0, 0, 1, 1], [], []>} : vector<3x8xbf16>, vector<8x256xbf16>, vector<3x256xf32> -> vector<3x256xf32>
    %c0_23 = arith.constant 0 : index
    %c0_24 = arith.constant 0 : index
    %c0_25 = arith.constant 0 : index
    %33 = vector.load %arg11[%c0_23, %c0_24, %c0_25] : memref<1x3x256xf32, #tpu.memory_space<vmem>>, vector<1x3x256xf32>
    %34 = vector.shape_cast %33 : vector<1x3x256xf32> to vector<3x256xf32>
    %35 = vector.shape_cast %32 : vector<3x256xf32> to vector<1x3x256xf32>
    tpu.vector_store %arg11[%c0_23, %c0_24, %c0_25], %35 {strides = array<i32>} : memref<1x3x256xf32, #tpu.memory_space<vmem>>, vector<1x3x256xf32>,
    return
  }
  func.func @transform_0(%arg0: i32, %arg1: i32) -> (i32, i32, i32) {
    %c0_i32 = arith.constant 0 : i32
    %c0_i32_0 = arith.constant 0 : i32
    return %arg0, %c0_i32, %arg1 : i32, i32, i32
  }
  func.func @transform_1(%arg0: i32, %arg1: i32) -> (i32, i32) {
    %c0_i32 = arith.constant 0 : i32
    %c0_i32_0 = arith.constant 0 : i32
    %c0_i32_1 = arith.constant 0 : i32
    return %c0_i32, %c0_i32_0 : i32, i32
  }
  func.func @transform_2(%arg0: i32, %arg1: i32) -> (i32, i32, i32) {
    %c0_i32 = arith.constant 0 : i32
    %c0_i32_0 = arith.constant 0 : i32
    %c0_i32_1 = arith.constant 0 : i32
    return %arg0, %c0_i32, %c0_i32_0 : i32, i32, i32
  }
  func.func @transform_3(%arg0: i32, %arg1: i32) -> (i32, i32, i32) {
    %c0_i32 = arith.constant 0 : i32
    %c0_i32_0 = arith.constant 0 : i32
    return %arg0, %c0_i32, %arg1 : i32, i32, i32
  }
  func.func @transform_4(%arg0: i32, %arg1: i32) -> (i32, i32) {
    %c0_i32 = arith.constant 0 : i32
    %c0_i32_0 = arith.constant 0 : i32
    %c0_i32_1 = arith.constant 0 : i32
    return %c0_i32, %c0_i32_0 : i32, i32
  }
  func.func @transform_5(%arg0: i32, %arg1: i32) -> (i32, i32) {
    %c0_i32 = arith.constant 0 : i32
    %c0_i32_0 = arith.constant 0 : i32
    %c0_i32_1 = arith.constant 0 : i32
    return %c0_i32, %c0_i32_0 : i32, i32
  }
  func.func @transform_6(%arg0: i32, %arg1: i32) -> (i32, i32) {
    %c0_i32 = arith.constant 0 : i32
    %c0_i32_0 = arith.constant 0 : i32
    %c0_i32_1 = arith.constant 0 : i32
    return %c0_i32, %c0_i32_0 : i32, i32
  }
  func.func @transform_7(%arg0: i32, %arg1: i32) -> (i32, i32, i32) {
    %c0_i32 = arith.constant 0 : i32
    %c0_i32_0 = arith.constant 0 : i32
    %c0_i32_1 = arith.constant 0 : i32
    return %arg0, %c0_i32, %c0_i32_0 : i32, i32, i32
  }
  func.func @transform_8(%arg0: i32, %arg1: i32) -> (i32, i32, i32) {
    %c0_i32 = arith.constant 0 : i32
    %c0_i32_0 = arith.constant 0 : i32
    return %arg0, %c0_i32, %arg1 : i32, i32, i32
  }
  func.func @transform_9(%arg0: i32, %arg1: i32) -> (i32, i32, i32) {
    %c0_i32 = arith.constant 0 : i32
    %c0_i32_0 = arith.constant 0 : i32
    return %arg0, %c0_i32, %arg1 : i32, i32, i32
  }
}

</mosaic_0001>

<bundles_post_ra>
// kernel: mul.205
= control target key start
LH: loop header
LB: loop body
LE: loop exit
PB: predicated region body
PF: predicated region fallthrough
CT: control target
= control target key end

     0   :  { %s7_s6 = smov 3  ;;  %s21_s9 = smov 3  ;;  %vm4_vm0 = vcmask 64512   ;;  %vm11_vm1 = vcmask 523712   ;;  %vm18_vm2 = vcmask 458112   ;;  %vm25_vm3 = vcmask 392512   ;;  %s119_s0 = inlined_call_operand.vmem [shape: f32[2,8,8], index: 0, kind: input, shape index: {}]   ;;  %s120_s1 = inlined_call_operand.vmem [shape: f32[2,64], index: 1, kind: output, shape index: {}]  }
   0x1   :  { %v61_v0 = vld [vmem:[%s119_s0 + $0x7] ss:$8 sm:%s7_s6]   ;;  %s75_s10 = smov 56   ;;  %v63_v1 = vld [vmem:[%s119_s0 + $0x5] ss:$8 sm:%s21_s9]   ;;  %s76_s13 = smov 40  }
   0x2   :  { %9 = vrot.lane.b32.xlu0 %v61_v0, %s75_s10  ;;  %23 = vrot.lane.b32.xlu1 %v63_v1, %s76_s13  ;;  %s14_s14 = smov 3  ;;  %s28_s15 = smov 3  ;;  %vm32_vm4 = vcmask 326912   ;;  %vm39_vm5 = vcmask 261312   ;;  %vm46_vm6 = vcmask 195712   ;;  %vm53_vm7 = vcmask 130112  }
   0x3   :  { %s35_s16 = smov 3  ;;  %v62_v3 = vld [vmem:[%s119_s0 + $0x6] ss:$8 sm:%s14_s14]   ;;  %s77_s21 = smov 24   ;;  %v64_v4 = vld [vmem:[%s119_s0 + $0x4] ss:$8 sm:%s28_s15]  }
   0x4   :  { %v65_v2 = vld [vmem:[%s119_s0 + $0x3] ss:$8 sm:%s35_s16]   ;;  %s42_s24 = smov 3  ;;  %s78_s25 = smov 48  }
   0x5   :  { %37 = vrot.lane.b32.xlu2 %v65_v2, %s77_s21  ;;  %s79_s26 = smov 32   ;;  %s49_s27 = smov 3  ;;  %v66_v5 = vld [vmem:[%s119_s0 + $0x2] ss:$8 sm:%s42_s24]  }
   0x6   :  { %v67_v6 = vld [vmem:[%s119_s0 + $0x1] ss:$8 sm:%s49_s27]   ;;  %s80_s3 = smov 16   ;;  %s81_s4 = smov 8  }
   0x7   :  { %s2_s5 = smov 3 }
   0x8   :  { %v3_v7 = vld [vmem:[%s119_s0] ss:$8 sm:%s2_s5]  }
   0x9   :  { %5 = vst.msk [vmem:[#allocation0] sm:$0x3] %vm4_vm0, %v3_v7  }
   0xa   :  { %16 = vrot.lane.b32.xlu0 %v62_v3, %s78_s25  ;;  %30 = vrot.lane.b32.xlu1 %v64_v4, %s79_s26 }
   0xd   :  { %44 = vrot.lane.b32.xlu2 %v66_v5, %s80_s3 }
  0x12   :  { %51 = vrot.lane.b32.xlu0 %v67_v6, %s81_s4 }
  0x5f   :  { %v38_v8 = vpop.permute.xlu2 %37  }
  0x67   :  { %v45_v9 = vpop.permute.xlu2 %44  }
  0x74   :  { %v10_v10 = vpop.permute.xlu0 %9   ;;  %v24_v11 = vpop.permute.xlu1 %23  }
  0x75   :  { %12 = vst.msk [vmem:[#allocation0] sm:$0x3] %vm11_vm1, %v10_v10  }
  0x7c   :  { %v17_v12 = vpop.permute.xlu0 %16   ;;  %v31_v13 = vpop.permute.xlu1 %30  }
  0x7d   :  { %19 = vst.msk [vmem:[#allocation0] sm:$0x3] %vm18_vm2, %v17_v12  }
  0x7e   :  { %26 = vst.msk [vmem:[#allocation0] sm:$0x3] %vm25_vm3, %v24_v11  }
  0x7f   :  { %33 = vst.msk [vmem:[#allocation0] sm:$0x3] %vm32_vm4, %v31_v13  }
  0x80   :  { %40 = vst.msk [vmem:[#allocation0] sm:$0x3] %vm39_vm5, %v38_v8  }
  0x81   :  { %47 = vst.msk [vmem:[#allocation0] sm:$0x3] %vm46_vm6, %v45_v9  }
  0x84   :  { %v52_v14 = vpop.permute.xlu0 %51  }
  0x85   :  { %54 = vst.msk [vmem:[#allocation0] sm:$0x3] %vm53_vm7, %v52_v14  }
  0x8c   :  { %v57_v15 = vld [vmem:[#allocation0] sm:$0x3] }
  0x8d   :  { %60 = vst [vmem:[%s120_s1] sm:$0x3] %v57_v15 }

// kernel: mul.142
= control target key start
LH: loop header
LB: loop body
LE: loop exit
PB: predicated region body
PF: predicated region fallthrough
CT: control target
= control target key end

     0   :  { %s29_s10 = smov 3  ;;  %s45_s11 = smov 12   ;;  %vm12_vm0 = vcmask 31744   ;;  %vm19_vm1 = vcmask 130144   ;;  %vm26_vm2 = vcmask 97344   ;;  %vm33_vm3 = vcmask 64544   ;;  %s67_s0 = inlined_call_operand.vmem [shape: f32[2,4,4], index: 0, kind: input, shape index: {}]   ;;  %s68_s1 = inlined_call_operand.vmem [shape: f32[2,16], index: 1, kind: output, shape index: {}]  }
   0x1   :  { %v41_v0 = vld [vmem:[%s67_s0 + $0x4] sm:$0xf]  ;;  %v8_v1 = vld [vmem:[%s67_s0] sm:$0xf]  ;;  %s15_s0 = smov 3  ;;  %s46_s12 = smov 4  }
   0x2   :  { %7 = vst [vmem:[#allocation1 + $0x8] sm:$0xf] %v41_v0  ;;  %s22_s13 = smov 3  ;;  %s47_s14 = smov 8  }
   0x3   :  { %9 = vst [vmem:[#allocation1] sm:$0xf] %v8_v1  ;;  %s10_s15 = smov 3 }
   0xa   :  { %v16_v2 = vld [vmem:[#allocation1 + $0x3] ss:$8 sm:%s15_s0]   ;;  %v30_v3 = vld [vmem:[#allocation1 + $0x1] ss:$8 sm:%s29_s10]   ;;  %v23_v4 = vld [vmem:[#allocation1 + $0x2] ss:$8 sm:%s22_s13]  }
   0xb   :  { %17 = vrot.lane.b32.xlu0 %v16_v2, %s45_s11  ;;  %31 = vrot.lane.b32.xlu1 %v30_v3, %s46_s12  ;;  %v11_v5 = vld [vmem:[#allocation1] ss:$8 sm:%s10_s15]  }
   0xc   :  { %13 = vst.msk [vmem:[#allocation0] sm:$0x3] %vm12_vm0, %v11_v5  }
  0x13   :  { %24 = vrot.lane.b32.xlu0 %v23_v4, %s47_s14 }
  0x7d   :  { %v18_v6 = vpop.permute.xlu0 %17   ;;  %v32_v7 = vpop.permute.xlu1 %31  }
  0x7e   :  { %20 = vst.msk [vmem:[#allocation0] sm:$0x3] %vm19_vm1, %v18_v6  }
  0x85   :  { %v25_v8 = vpop.permute.xlu0 %24  }
  0x86   :  { %27 = vst.msk [vmem:[#allocation0] sm:$0x3] %vm26_vm2, %v25_v8  }
  0x87   :  { %34 = vst.msk [vmem:[#allocation0] sm:$0x3] %vm33_vm3, %v32_v7  }
  0x8e   :  { %v37_v9 = vld [vmem:[#allocation0] sm:$0x3] }
  0x8f   :  { %40 = vst [vmem:[%s68_s1] sm:$0x3] %v37_v9 }

// kernel: _lambda_.2
= control target key start
LH: loop header
LB: loop body
LE: loop exit
PB: predicated region body
PF: predicated region fallthrough
CT: control target
= control target key end

     0   :  { %s892_s21 = smov 0   ;;  %s894_s22 = smov 0   ;;  %s1000_s0 = inlined_call_operand.vmem [shape: bf16[2,144,256], index: 0, kind: input, shape index: {}]   ;;  %s1001_s1 = inlined_call_operand.vmem [shape: bf16[8,144], index: 1, kind: input, shape index: {}]   ;;  %s1002_s2 = inlined_call_operand.vmem [shape: f32[2,1,144], index: 2, kind: input, shape index: {}]   ;;  %s1003_s3 = inlined_call_operand.vmem [shape: f32[2,1,256], index: 3, kind: input, shape index: {}]   ;;  %s1004_s4 = inlined_call_operand.vmem [shape: f32[8,1], index: 4, kind: input, shape index: {}]   ;;  %s1005_s5 = inlined_call_operand.vmem [shape: f32[8,1], index: 5, kind: input, shape index: {}]   ;;  %s1006_s6 = inlined_call_operand.vmem [shape: bf16[2,8,256], index: 6, kind: output, shape index: {}]  }
   0x1   :  { %s896_s23 = smov 0  }
   0x2 LB: > { %s28_s24 = sadd.s32 1, %s850_s22  ;;  %p701_p0 = scmp.ge.s32.totalorder %s854_s23, 1  ;;  %s854_s23 = sphi %s896_s23, %s16_s23   ;;  %s850_s22 = sphi %s894_s22, %s1008_s22   ;;  %s846_s21 = sphi %s892_s21, %s1007_s21  }
   0x3   : > { %p30_p1 = scmp.ge.s32.totalorder %s28_s24, 2  ;;  %p258_p2 = scmp.lt.s32.totalorder %s854_s23, 3 }
   0x5   : > { %s1010_s24 = smov (%p30_p1, %s28_s24), 0  ;;  %p259_p3 = pnand %p701_p0, %p258_p2 }
   0x6   : > { %p309_p4 = scmp.lt.s32.totalorder (!%p259_p3), %s846_s21, 1 }
   0x7   : > { %262 = sbr.rel (%p259_p3) target bundleno = 322 (0x142), region = 44 }
   0xc   : > { %s1012_s21 = smov (!%p309_p4, %s846_s21), 1  ;;  %v346_v0 = vld [vmem:[%s1001_s1] sm:$0xff]  ;;  %vm359_vm0 = vcmask 130048   ;;  %vm378_vm3 = vcmask 1043456   ;;  %vm379_vm4 = vcmask 130052  }
   0xd   : > { %s703_s27 = sshll.u32 %s1012_s21, 1  ;;  %v347_v1 = vunpack.c.l.bf16 %v346_v0  ;;  %v348_v2 = vunpack.c.h.bf16 %v346_v0  ;;  %s802_s7 = smul.u32 144, %s1012_s21  ;;  %vm380_vm6 = vmor %vm379_vm4, %vm378_vm3 }
   0xe   : > { %s321_s30 = scalar_lea.vmem %s1002_s2, %s703_s27  ;;  %s329_s17 = scalar_lea.vmem %s1003_s3, %s703_s27 }
   0xf   : > { %v349_v3 = vld [vmem:[%s321_s30] sm:$0x3]  ;;  %s934_s10 = scalar_lea.vmem %s1000_s0, %s802_s7  ;;  %s783_s18 = sshll.u32 %s1012_s21, 3 }
  0x10   : > { %v351_v4 = vperm.slane %v349_v3, 0  ;;  %v352_v5 = vperm.slane %v349_v3, 1  ;;  %v765_v12 = vld [vmem:[%s934_s10 + $0x70] sm:$0xf]  ;;  %v799_v13 = vld [vmem:[%s934_s10 + $0x74] sm:$0xf0]  ;;  %s339_s25 = scalar_lea.vmem %s1006_s6, %s783_s18 }
  0x11   : > { %v798_v14 = vld [vmem:[%s934_s10 + $0x74] sm:$0xf]  ;;  %v766_v15 = vor.u32 %v799_v13, %v765_v12  ;;  %v767_v16 = vld [vmem:[%s934_s10 + $0x78] sm:$0xf0]  ;;  %v757_v18 = vld [vmem:[%s934_s10 + $0x60] sm:$0xf] }
  0x12   : > { %v921_v6 = vmul.f32 %v351_v4, %v347_v1  ;;  %v923_v7 = vmul.f32 %v352_v5, %v348_v2  ;;  %v770_v17 = vor.u32 %v798_v14, %v767_v16  ;;  %v797_v19 = vld [vmem:[%s934_s10 + $0x64] sm:$0xf0]  ;;  %v796_v20 = vld [vmem:[%s934_s10 + $0x64] sm:$0xf]  ;;  %v759_v22 = vld [vmem:[%s934_s10 + $0x68] sm:$0xf0] }
  0x13   : > { %515 = vmatpush.bf16.msra.mxu0 %v766_v15  ;;  %v758_v21 = vor.u32 %v797_v19, %v757_v18  ;;  %v762_v23 = vor.u32 %v796_v20, %v759_v22  ;;  %v749_v24 = vld [vmem:[%s934_s10 + $0x50] sm:$0xf]  ;;  %v795_v25 = vld [vmem:[%s934_s10 + $0x54] sm:$0xf0]  ;;  %v794_v26 = vld [vmem:[%s934_s10 + $0x54] sm:$0xf] }
  0x14   : > { %v357_v8 = vmul.f32 %v921_v6, %v921_v6  ;;  %v358_v9 = vmul.f32 %v923_v7, %v923_v7  ;;  %541 = vmatpush.bf16.msra.mxu2 %v770_v17  ;;  %v750_v27 = vor.u32 %v795_v25, %v749_v24  ;;  %v751_v28 = vld [vmem:[%s934_s10 + $0x58] sm:$0xf0]  ;;  %v741_v30 = vld [vmem:[%s934_s10 + $0x40] sm:$0xf]  ;;  %v793_v31 = vld [vmem:[%s934_s10 + $0x44] sm:$0xf0] }
  0x15   : > { %v754_v29 = vor.u32 %v794_v26, %v751_v28  ;;  %v792_v32 = vld [vmem:[%s934_s10 + $0x44] sm:$0xf]  ;;  %v742_v33 = vor.u32 %v793_v31, %v741_v30  ;;  %v743_v34 = vld [vmem:[%s934_s10 + $0x48] sm:$0xf0]  ;;  %v733_v36 = vld [vmem:[%s934_s10 + $0x30] sm:$0xf] }
  0x16   : > { %v360_v10 = vsel %vm359_vm0, %v358_v9, 0.0  ;;  %v746_v35 = vor.u32 %v792_v32, %v743_v34  ;;  %v791_v37 = vld [vmem:[%s934_s10 + $0x34] sm:$0xf0]  ;;  %v790_v38 = vld [vmem:[%s934_s10 + $0x34] sm:$0xf]  ;;  %v401_v4 = vld [vmem:[%s1004_s4] sm:$0xff] }
  0x17   : > { %v361_v11 = vadd.f32 %v360_v10, %v357_v8  ;;  %516 = vmatpush.bf16.msra.mxu0 %v758_v21  ;;  %v734_v39 = vor.u32 %v791_v37, %v733_v36  ;;  %v735_v40 = vld [vmem:[%s934_s10 + $0x38] sm:$0xf0]  ;;  %v725_v42 = vld [vmem:[%s934_s10 + $0x20] sm:$0xf]  ;;  %v789_v43 = vld [vmem:[%s934_s10 + $0x24] sm:$0xf0] }
  0x18   : > { %542 = vmatpush.bf16.msra.mxu2 %v762_v23  ;;  %v738_v41 = vor.u32 %v790_v38, %v735_v40  ;;  %v788_v44 = vld [vmem:[%s934_s10 + $0x24] sm:$0xf]  ;;  %v726_v45 = vor.u32 %v789_v43, %v725_v42  ;;  %v727_v46 = vld [vmem:[%s934_s10 + $0x28] sm:$0xf0]  ;;  %v717_v48 = vld [vmem:[%s934_s10 + $0x10] sm:$0xf] }
  0x19   : > { %362 = vadd.xlane.f32.xlu0 %v361_v11  ;;  %v730_v47 = vor.u32 %v788_v44, %v727_v46  ;;  %v787_v49 = vld [vmem:[%s934_s10 + $0x14] sm:$0xf0]  ;;  %v786_v50 = vld [vmem:[%s934_s10 + $0x14] sm:$0xf]  ;;  %v719_v52 = vld [vmem:[%s934_s10 + $0x18] sm:$0xf0] }
  0x1a   : > { %v718_v51 = vor.u32 %v787_v49, %v717_v48  ;;  %v709_v53 = vld [vmem:[%s934_s10] sm:$0xf]  ;;  %v785_v54 = vld [vmem:[%s934_s10 + $0x4] sm:$0xf0]  ;;  %v722_v55 = vor.u32 %v786_v50, %v719_v52  ;;  %v784_v58 = vld [vmem:[%s934_s10 + $0x4] sm:$0xf] }
  0x1b   : > { %517 = vmatpush.bf16.msra.mxu0 %v750_v27  ;;  %v773_v56 = vld [vmem:[%s934_s10 + $0x80] sm:$0xf]  ;;  %v801_v57 = vld [vmem:[%s934_s10 + $0x84] sm:$0xf0]  ;;  %v711_v60 = vld [vmem:[%s934_s10 + $0x8] sm:$0xf0]  ;;  %v710_v0 = vor.u32 %v785_v54, %v709_v53 }
  0x1c   : > { %543 = vmatpush.bf16.msra.mxu2 %v754_v29  ;;  %v774_v59 = vor.u32 %v801_v57, %v773_v56  ;;  %v800_v61 = vld [vmem:[%s934_s10 + $0x84] sm:$0xf]  ;;  %v775_v62 = vld [vmem:[%s934_s10 + $0x88] sm:$0xf0]  ;;  %v714_v1 = vor.u32 %v784_v58, %v711_v60  ;;  %v856_v8 = vmov 0  }
  0x1d   : > { %v778_v63 = vor.u32 %v800_v61, %v775_v62  ;;  %v567_v5 = vld [vmem:[%s1005_s5] sm:$0xff]  ;;  %828 = vset.pattern.permute.xlu0 %v856_v8  ;;  %829 = vset.pattern.permute.xlu1 %v856_v8 }
  0x1e   : > { %535 = vmatpush.bf16.msra.mxu1 %v774_v59  ;;  %570 = vperm.xlu1 %829, %v567_v5  }
  0x1f   : > { %518 = vmatpush.bf16.msra.mxu0 %v742_v33  ;;  %561 = vmatpush.bf16.msra.mxu3 %v778_v63 }
  0x20   : > { %544 = vmatpush.bf16.msra.mxu2 %v746_v35 }
  0x23   : > { %519 = vmatpush.bf16.msra.mxu0 %v734_v39 }
  0x24   : > { %545 = vmatpush.bf16.msra.mxu2 %v738_v41 }
  0x27   : > { %520 = vmatpush.bf16.msra.mxu0 %v726_v45 }
  0x28   : > { %546 = vmatpush.bf16.msra.mxu2 %v730_v47 }
  0x2b   : > { %521 = vmatpush.bf16.msra.mxu0 %v718_v51 }
  0x2c   : > { %547 = vmatpush.bf16.msra.mxu2 %v722_v55 }
  0x2d   : > { %405 = vperm.xlu0 %828, %v401_v4  }
  0x2f   : > { %522 = vmatpush.bf16.msra.mxu0 %v710_v0 }
  0x30   : > { %548 = vmatpush.bf16.msra.mxu2 %v714_v1 }
  0x8c   : > { %v363_v2 = vpop.xlane.xlu0 %362 }
  0x8d   : > { %v364_v3 = vadd.f32 1e-08, %v363_v2 }
  0x8f   : > { %830 = vrsqrt.f32 %v364_v3  ;;  %vm371_vm2 = vweird.f32 %v364_v3 }
  0x90   : > { %v571_v32 = vpop.permute.xlu1 %570 }
  0x95   : > { %v831_v9 = vpop.eup %830 }
  0x96   : > { %v366_v10 = vmul.f32 %v831_v9, %v364_v3  ;;  %vm372_vm1 = vweird.f32 %v831_v9 }
  0x97   : > { %vm373_vm5 = vmor %vm371_vm2, %vm372_vm1 }
  0x98   : > { %v367_v11 = vmul.f32 %v831_v9, %v366_v10 }
  0x9a   : > { %v368_v12 = vmul.f32 0.5, %v367_v11 }
  0x9c   : > { %v369_v13 = vsub.f32 1.5, %v368_v12 }
  0x9e   : > { %v370_v14 = vmul.f32 %v831_v9, %v369_v13 }
  0x9f   : > { %v406_v24 = vpop.permute.xlu0 %405 }
  0xa0   : > { %v374_v15 = vsel %vm373_vm5, %v831_v9, %v370_v14 }
  0xa1   : > { %v375_v16 = vmul.f32 %v374_v15, %v921_v6  ;;  %v376_v17 = vmul.f32 %v374_v15, %v923_v7  ;;  %v402_v6 = vld [vmem:[%s329_s17] sm:$0x3] }
  0xa2   : > { %v409_v7 = vperm.slane %v402_v6, 0  ;;  %v410_v26 = vperm.slane %v402_v6, 1 }
  0xa3   : > { %v377_v18 = vpack.c.bf16 %v376_v17, %v375_v16 }
  0xa4   : > { %v413_v25 = vmul.f32 %v409_v7, %v406_v24  ;;  %v414_v30 = vmul.f32 %v410_v26, %v406_v24 }
  0xa5   : > { %381 = vst.msk [vmem:[#allocation2] sm:$0xff] %vm380_vm6, %v377_v18 }
  0xac   : > { %v382_v19 = vld [vmem:[#allocation2] sm:$0xff] }
  0xad   : > { %v416_v20 = vunpack.c.l.b16 %v382_v19  ;;  %v417_v21 = vunpack.c.h.b16 %v382_v19 }
  0xaf   : > { %v418_v22 = vpack.c.b16 %v416_v20, %v416_v20  ;;  %v419_v23 = vpack.c.b16 %v417_v21, %v417_v21 }
  0xb1   : > { %523 = vmatmul.bf16.vlgmr.msra.gmra.mxu0 %v418_v22  ;;  %779 = vmatmul.msk.bf16.vlgmr.msra.gmra.mxu1 %vm359_vm0, %v419_v23 }
  0xb2   : > { %549 = vmatmul.bf16.vlgmr.msra.gmra.mxu2 %v418_v22  ;;  %780 = vmatmul.msk.bf16.vlgmr.msra.gmra.mxu3 %vm359_vm0, %v419_v23 }
 0x12e   : > { %v524_v27 = vpop.f32.mrf.mxu0  ;;  %v537_v28 = vpop.f32.mrf.mxu1 }
 0x12f   : > { %v525_v29 = vadd.f32 %v524_v27, %v413_v25 }
 0x131   : > { %v538_v31 = vadd.f32 %v537_v28, %v525_v29 }
 0x133   : > { %v573_v35 = vadd.f32 %v571_v32, %v538_v31 }
 0x135   : > { %v550_v33 = vpop.f32.mrf.mxu2  ;;  %v563_v34 = vpop.f32.mrf.mxu3  ;;  %v577_v40 = vmul.f32 0.2, %v573_v35  ;;  %vm575_vm7 = vcmp.ge.f32.partialorder %v573_v35, 0.0 }
 0x136   : > { %v551_v36 = vadd.f32 %v550_v33, %v414_v30  ;;  %v526_v37 = vpop.f32.mrf.mxu0  ;;  %v539_v38 = vpop.f32.mrf.mxu1 }
 0x137   : > { %v579_v45 = vsel %vm575_vm7, %v573_v35, %v577_v40 }
 0x138   : > { %v564_v39 = vadd.f32 %v563_v34, %v551_v36 }
 0x13a   : > { %v574_v41 = vadd.f32 %v571_v32, %v564_v39 }
 0x13c   : > { %vm576_vm8 = vcmp.ge.f32.partialorder %v574_v41, 0.0  ;;  %v578_v42 = vmul.f32 0.2, %v574_v41 }
 0x13d   : > { %v552_v43 = vpop.f32.mrf.mxu2  ;;  %v565_v44 = vpop.f32.mrf.mxu3 }
 0x13e   : > { %v580_v46 = vsel %vm576_vm8, %v574_v41, %v578_v42 }
 0x13f   : > { %v581_v47 = vpack.c.bf16 %v580_v46, %v579_v45 }
 0x141   : > { %582 = vst [vmem:[%s339_s25] sm:$0xff] %v581_v47 }
 0x142 PF: > { %s16_s23 = sadd.s32 1, %s854_s23   ;;  %s1007_s21 = smov %s850_s22 }
 0x143   : > { %p13_p5 = scmp.ge.s32.totalorder %s16_s23, 4   ;;  %s1008_s22 = smov %s1010_s24 }
 0x145   :  { %15 = sbr.rel (!%p13_p5) target bundleno = 2 (0x2), region = 84 }

// kernel: _lambda_.3
= control target key start
LH: loop header
LB: loop body
LE: loop exit
PB: predicated region body
PF: predicated region fallthrough
CT: control target
= control target key end

     0   :  { %s1255_s0 = inlined_call_operand.vmem [shape: bf16[2,72,256], index: 0, kind: input, shape index: {}]   ;;  %s1256_s1 = inlined_call_operand.vmem [shape: bf16[8,72], index: 1, kind: input, shape index: {}]   ;;  %s1257_s2 = inlined_call_operand.vmem [shape: f32[2,1,72], index: 2, kind: input, shape index: {}]   ;;  %s1258_s3 = inlined_call_operand.vmem [shape: f32[2,1,256], index: 3, kind: input, shape index: {}]   ;;  %s1259_s4 = inlined_call_operand.vmem [shape: f32[8,1], index: 4, kind: input, shape index: {}]   ;;  %s1260_s5 = inlined_call_operand.vmem [shape: f32[8,1], index: 5, kind: input, shape index: {}]   ;;  %s1261_s6 = inlined_call_operand.vmem [shape: f32[3,8], index: 6, kind: input, shape index: {}]   ;;  %s1262_s7 = inlined_call_operand.vmem [shape: f32[2,1,8], index: 7, kind: input, shape index: {}]   ;;  %s1263_s8 = inlined_call_operand.hbm [shape: bf16[2,8,256], index: 8, kind: output, shape index: {0}]   ;;  %s1264_s9 = inlined_call_operand.vmem [shape: f32[2,3,256], index: 9, kind: output, shape index: {1}]  }
   0x1   :  { %1265 = sst [smem:[#allocation6_spill]] %s1255_s0 }
   0x2   :  { %1266 = sst [smem:[#allocation7_spill]] %s1256_s1 }
   0x3   :  { %1267 = sst [smem:[#allocation8_spill]] %s1257_s2 }
   0x4   :  { %1268 = sst [smem:[#allocation9_spill]] %s1258_s3 }
   0x5   :  { %15 = vsyncpa [#allocation4], 0 }
   0x6   :  { %17 = vsyncpa [#allocation4 + $0x1], 0  ;;  %s1088_s30 = smov 0   ;;  %s1090_s10 = smov 0  }
   0x7   :  { %s1092_s11 = smov 0   ;;  %s1094_s12 = smov 0  }
   0x8   :  { %s1096_s13 = smov 0   ;;  %s1098_s14 = smov 0  }
   0x9 LB: > { %s833_s15 = sadd.s32 4294967295, %s1035_s14   ;;  %s834_s16 = sadd.s32 4294967294, %s1035_s14   ;;  %s1035_s14 = sphi %s1098_s14, %s23_s14   ;;  %s1031_s13 = sphi %s1096_s13, %s1279_s13   ;;  %s1027_s12 = sphi %s1094_s12, %s1278_s12   ;;  %s1023_s11 = sphi %s1092_s11, %s1277_s11   ;;  %s1019_s10 = sphi %s1090_s10, %s1276_s10   ;;  %s1015_s30 = sphi %s1088_s30, %s1275_s30  }
   0xa   : > { %s35_s17 = sadd.s32 1, %s1031_s13  ;;  %s236_s18 = sadd.s32 1, %s1023_s11 }
   0xb   : > { %p37_p0 = scmp.ge.s32.totalorder %s35_s17, 2  ;;  %p246_p1 = scmp.ne.s32.totalorder %s1023_s11, %s1019_s10 }
   0xc   : > { %p247_p2 = scmp.eq.s32.totalorder %s833_s15, 1  ;;  %p252_p3 = scmp.ne.s32.totalorder %s1019_s10, %s1015_s30 }
   0xd   : > { %s1281_s17 = smov (%p37_p0, %s35_s17), 0  ;;  %p253_p5 = scmp.eq.s32.totalorder %s834_s16, 1 }
   0xe   : > { %p1128_p4 = por %p247_p2, %p246_p1  ;;  %s231_s20 = ssub.s32 %s1031_s13, %s1281_s17 }
   0xf   : > { %p837_p6 = scmp.ge.s32.totalorder %s1035_s14, 1  ;;  %p234_p7 = scmp.eq.s32.totalorder %s231_s20, 0 }
  0x10   : > { %p1135_p8 = por %p253_p5, %p252_p3  ;;  %p348_p9 = scmp.lt.s32.totalorder %s1035_s14, 3 }
  0x11   : > { %s1141_s22 = scalar_select %p234_p7, %s1023_s11, %s236_s18  }
  0x12   : > { %p349_p10 = pnand %p837_p6, %p348_p9 }
  0x13   : > { %p412_p11 = scmp.lt.s32.totalorder (!%p349_p10), %s1027_s12, 1  ;;  %s1271_s1 = sld [smem:[#allocation7_spill]] (!%p349_p10) }
  0x14   : > { %352 = sbr.rel (%p349_p10) target bundleno = 465 (0x1d1), region = 52  ;;  %s1272_s2 = sld [smem:[#allocation8_spill]] (!%p349_p10) }
  0x15   : > { %s1273_s0 = sld [smem:[#allocation6_spill]] (!%p349_p10)  ;;  %s397_s23 = sand.u32 (!%p349_p10), 1, %s1019_s10  }
  0x16   : > { %s1274_s3 = sld [smem:[#allocation9_spill]] (!%p349_p10)  ;;  %s1204_s24 = sshll.u32 (!%p349_p10), %s397_s23, 3 }
  0x17   : > { %s656_s26 = scalar_lea.sflag (!%p349_p10), [#allocation4], %s397_s23 }
  0x19   : > { %v452_v0 = vld [vmem:[%s1271_s1] sm:$0xf]  ;;  %s1148_s25 = scalar_select %p412_p11, %s1027_s12, 1  ;;  %vm460_vm0 = vcmask 588800   ;;  %vm552_vm1 = vcmask 1043456   ;;  %v1037_v41 = vmov 0  }
  0x1a   : > { %v453_v1 = vunpack.c.l.bf16 %v452_v0  ;;  %v489_v39 = vld [vmem:[%s1259_s4] sm:$0xff]  ;;  %951 = vset.pattern.permute.xlu0 %v1037_v41  ;;  %952 = vset.pattern.permute.xlu1 %v1037_v41  ;;  %vm477_vm5 = vcmask 584704   ;;  %vm613_vm8 = vcmask 64512  }
  0x1b   : > { %s423_s28 = scalar_lea.vmem %s1272_s2, %s1148_s25  ;;  %s894_s29 = smul.u32 72, %s1148_s25  ;;  %v585_v40 = vld [vmem:[%s1260_s5] sm:$0xff] }
  0x1c   : > { %v953_v2 = vld [vmem:[%s423_s28] ss:$0 sm:$0xff]  ;;  %588 = vperm.xlu1 %952, %v585_v40   ;;  %s840_s15 = sshll.u32 %s1148_s25, 1  ;;  %s399_s28 = scalar_lea.vmem [#allocation3], %s1204_s24 }
  0x1d   : > { %v1154_v3 = vmul.f32 %v953_v2, %v453_v1  ;;  %s1163_s18 = scalar_lea.vmem %s1273_s0, %s894_s29  ;;  %s435_s29 = scalar_lea.vmem %s1262_s7, %s1148_s25 }
  0x1e   : > { %v488_v6 = vld [vmem:[%s1163_s18 + $0x40] sm:$0xff]  ;;  %v869_v13 = vld [vmem:[%s1163_s18 + $0x30] sm:$0xf]  ;;  %v892_v14 = vld [vmem:[%s1163_s18 + $0x34] sm:$0xf0]  ;;  %s431_s20 = scalar_lea.vmem %s1274_s3, %s840_s15 }
  0x1f   : > { %v459_v4 = vmul.f32 %v1154_v3, %v1154_v3  ;;  %v528_v7 = vunpack.c.l.b16 %v488_v6  ;;  %v529_v8 = vunpack.c.h.b16 %v488_v6  ;;  %v891_v15 = vld [vmem:[%s1163_s18 + $0x34] sm:$0xf]  ;;  %v870_v16 = vor.u32 %v892_v14, %v869_v13  ;;  %v871_v17 = vld [vmem:[%s1163_s18 + $0x38] sm:$0xf0]  ;;  %v861_v19 = vld [vmem:[%s1163_s18 + $0x20] sm:$0xf] }
  0x20   : > { %v874_v18 = vor.u32 %v891_v15, %v871_v17  ;;  %v890_v20 = vld [vmem:[%s1163_s18 + $0x24] sm:$0xf0]  ;;  %v889_v21 = vld [vmem:[%s1163_s18 + $0x24] sm:$0xf]  ;;  %v863_v23 = vld [vmem:[%s1163_s18 + $0x28] sm:$0xf0] }
  0x21   : > { %v461_v5 = vsel %vm460_vm0, %v459_v4, 0.0  ;;  %v538_v9 = vpack.c.b16 %v528_v7, %v528_v7  ;;  %v539_v10 = vpack.c.b16 %v529_v8, %v529_v8  ;;  %v862_v22 = vor.u32 %v890_v20, %v861_v19  ;;  %v853_v25 = vld [vmem:[%s1163_s18 + $0x10] sm:$0xf]  ;;  %v888_v26 = vld [vmem:[%s1163_s18 + $0x14] sm:$0xf0] }
  0x22   : > { %462 = vadd.xlane.f32.xlu0 %v461_v5  ;;  %v866_v24 = vor.u32 %v889_v21, %v863_v23  ;;  %v887_v27 = vld [vmem:[%s1163_s18 + $0x14] sm:$0xf]  ;;  %v854_v28 = vor.u32 %v888_v26, %v853_v25  ;;  %v855_v29 = vld [vmem:[%s1163_s18 + $0x18] sm:$0xf0]  ;;  %v845_v31 = vld [vmem:[%s1163_s18] sm:$0xf] }
  0x23   : > { %v554_v11 = vsel %vm552_vm1, %v538_v9, 0  ;;  %v557_v12 = vsel %vm552_vm1, %v539_v10, 0  ;;  %v858_v30 = vor.u32 %v887_v27, %v855_v29  ;;  %v886_v32 = vld [vmem:[%s1163_s18 + $0x4] sm:$0xf0]  ;;  %v885_v33 = vld [vmem:[%s1163_s18 + $0x4] sm:$0xf] }
  0x24   : > { %562 = vmatpush.bf16.msra.mxu0 %v554_v11  ;;  %575 = vmatpush.bf16.msra.mxu1 %v557_v12  ;;  %v846_v34 = vor.u32 %v886_v32, %v845_v31  ;;  %v847_v35 = vld [vmem:[%s1163_s18 + $0x8] sm:$0xf0]  ;;  %v490_v52 = vld [vmem:[%s431_s20] sm:$0x3]  ;;  %s680_s20 = sshll.u32 %s399_s28, 4  ;;  %s681_s20 = int_to_ptr.vmem [resolvable:$true] %s680_s20 }
  0x25   : > { %v850_v36 = vor.u32 %v885_v33, %v847_v35  ;;  %v497_v53 = vperm.slane %v490_v52, 0  ;;  %v498_v54 = vperm.slane %v490_v52, 1  ;;  %v601_v6 = vld [vmem:[%s1261_s6] sm:$0x7] }
  0x28   : > { %563 = vmatpush.bf16.msra.mxu0 %v870_v16  ;;  %576 = vmatpush.bf16.msra.mxu1 %v874_v18 }
  0x2c   : > { %564 = vmatpush.bf16.msra.mxu0 %v862_v22  ;;  %577 = vmatpush.bf16.msra.mxu1 %v866_v24 }
  0x30   : > { %565 = vmatpush.bf16.msra.mxu0 %v854_v28  ;;  %578 = vmatpush.bf16.msra.mxu1 %v858_v30 }
  0x34   : > { %566 = vmatpush.bf16.msra.mxu0 %v846_v34  ;;  %579 = vmatpush.bf16.msra.mxu1 %v850_v36 }
  0x36   : > { %493 = vperm.xlu0 %951, %v489_v39  }
  0x8e   : > { %v589_v58 = vpop.permute.xlu1 %588 }
  0x95   : > { %v463_v37 = vpop.xlane.xlu0 %462 }
  0x96   : > { %v464_v38 = vadd.f32 1e-08, %v463_v37 }
  0x98   : > { %955 = vrsqrt.f32 %v464_v38  ;;  %vm471_vm3 = vweird.f32 %v464_v38 }
  0x9e   : > { %v956_v42 = vpop.eup %955 }
  0x9f   : > { %v466_v43 = vmul.f32 %v956_v42, %v464_v38  ;;  %vm472_vm2 = vweird.f32 %v956_v42 }
  0xa0   : > { %vm473_vm4 = vmor %vm471_vm3, %vm472_vm2 }
  0xa1   : > { %v467_v44 = vmul.f32 %v956_v42, %v466_v43 }
  0xa3   : > { %v468_v45 = vmul.f32 0.5, %v467_v44 }
  0xa5   : > { %v469_v46 = vsub.f32 1.5, %v468_v45 }
  0xa7   : > { %v470_v47 = vmul.f32 %v956_v42, %v469_v46 }
  0xa8   : > { %v494_v55 = vpop.permute.xlu0 %493 }
  0xa9   : > { %v474_v48 = vsel %vm473_vm4, %v956_v42, %v470_v47  ;;  %v501_v56 = vmul.f32 %v497_v53, %v494_v55  ;;  %v502_v57 = vmul.f32 %v498_v54, %v494_v55 }
  0xaa   : > { %v475_v49 = vmul.f32 %v474_v48, %v1154_v3  ;;  %v954_v3 = vld [vmem:[%s435_s29] ss:$0 sm:$0xff]  ;;  %s893_s29 = sshll.u32 %s1027_s12, 3  ;;  %s977_s12 = scalar_lea.hbm %s1263_s8, 16 }
  0xab   : > { %v606_v12 = vmul.f32 %v954_v3, %v601_v6  ;;  %s678_s18 = scalar_lea.hbm %s1263_s8, %s893_s29 }
  0xac   : > { %v476_v50 = vpack.c.bf16 %v475_v49, %v475_v49  ;;  %s682_s24 = sshll.u32 %s678_s18, 4  ;;  %s683_s24 = int_to_ptr.hbm [resolvable:$true] %s682_s24 }
  0xad   : > { %v607_v17 = vpack.c.bf16 %v606_v12, %v606_v12  ;;  %s971_s27 = sshra.s32 %s683_s24, 4  ;;  %s972_s27 = int_to_ptr.hbm [resolvable:$true] %s971_s27 }
  0xae   : > { %478 = vst.msk [vmem:[#allocation2] sm:$0xf] %vm477_vm5, %v476_v50  ;;  %s973_s0 = scalar_lea.hbm %s972_s27, 8  ;;  %p978_p1 = scmp.lt.s32.totalorder %s972_s27, %s1263_s8 }
  0xaf   : > { %p974_p12 = scmp.ne.s32.totalorder %s972_s27, %s973_s0  ;;  %p979_p2 = scmp.lt.s32.totalorder %s977_s12, %s973_s0 }
  0xb1   : > { %p975_p13 = pnand %p974_p12, %p1128_p4  ;;  %p980_p3 = por %p979_p2, %p978_p1 }
  0xb3   : > { %p976_p0 = pneg %p975_p13 }
  0xb5   : > { %v479_v51 = vld [vmem:[#allocation2] sm:$0xf]  ;;  %p981_p5 = pnand %p980_p3, %p976_p0 }
  0xb6   : > { %875 = vmatmul.msk.bf16.vlgmr.msra.gmra.mxu0 %vm460_vm0, %v479_v51  ;;  %876 = vmatmul.msk.bf16.vlgmr.msra.gmra.mxu1 %vm460_vm0, %v479_v51 }
 0x133   : > { %v568_v59 = vpop.f32.mrf.mxu0  ;;  %v581_v60 = vpop.f32.mrf.mxu1 }
 0x134   : > { %v569_v61 = vadd.f32 %v568_v59, %v501_v56  ;;  %v582_v62 = vadd.f32 %v581_v60, %v502_v57 }
 0x136   : > { %v591_v63 = vadd.f32 %v589_v58, %v569_v61  ;;  %v592_v0 = vadd.f32 %v589_v58, %v582_v62 }
 0x138   : > { %vm593_vm6 = vcmp.ge.f32.partialorder %v591_v63, 0.0  ;;  %vm594_vm7 = vcmp.ge.f32.partialorder %v592_v0, 0.0  ;;  %v595_v1 = vmul.f32 0.2, %v591_v63  ;;  %v596_v2 = vmul.f32 0.2, %v592_v0 }
 0x13a   : > { %v597_v4 = vsel %vm593_vm6, %v591_v63, %v595_v1  ;;  %v598_v5 = vsel %vm594_vm7, %v592_v0, %v596_v2 }
 0x13b   : > { %v599_v7 = vpack.c.bf16 %v598_v5, %v597_v4  ;;  %v570_v8 = vpop.f32.mrf.mxu0  ;;  %v583_v9 = vpop.f32.mrf.mxu1 }
 0x13d   : > { %v609_v10 = vunpack.c.l.b16 %v599_v7  ;;  %v610_v11 = vunpack.c.h.b16 %v599_v7  ;;  %600 = vst [vmem:[%s399_s28] sm:$0xff] %v599_v7 }
 0x13f   : > { %v611_v13 = vpack.c.b16 %v609_v10, %v609_v10  ;;  %v612_v14 = vpack.c.b16 %v610_v11, %v610_v11 }
 0x141   : > { %v618_v15 = vsel %vm552_vm1, %v611_v13, 0  ;;  %v621_v16 = vsel %vm552_vm1, %v612_v14, 0 }
 0x142   : > { %630 = vmatpush.bf16.msra.mxu2 %v618_v15  ;;  %643 = vmatpush.bf16.msra.mxu3 %v621_v16 }
 0x145   : > { %877 = vmatmul.msk.bf16.vlgmr.msra.gmra.mxu2 %vm613_vm8, %v607_v17  ;;  %878 = vmatmul.msk.bf16.vlgmr.msra.gmra.mxu3 %vm613_vm8, %v607_v17 }
 0x146   : > { %984 = shalt.err (!%p981_p5)
}
 0x147   : > { %895 = dma.vmem_to_hbm [thread:$0]  (%p1128_p4), %s681_s20, 128, %s683_s24, %s656_s26  }
 0x148   : > { %s884_s23 = sshll.u32 %s1148_s25, 3 }
 0x149   : > { %s445_s1 = scalar_lea.vmem %s1264_s9, %s884_s23 }
 0x1c8   : > { %v632_v18 = vpop.f32.mrf.mxu2  ;;  %v645_v19 = vpop.f32.mrf.mxu3 }
 0x1c9   : > { %v651_v20 = vrot.slane %v645_v19, 4 }
 0x1cb   : > { %v652_v21 = vsel %vm552_vm1, %v632_v18, %v651_v20 }
 0x1cc   : > { %654 = vst [vmem:[%s445_s1] sm:$0x77] %v652_v21 }
 0x1d0   : > { %v634_v22 = vpop.f32.mrf.mxu2  ;;  %v647_v23 = vpop.f32.mrf.mxu3 }
 0x1d1 PF: > { %p901_p6 = scmp.ge.s32.totalorder %s1035_s14, 2  ;;  %s698_s0 = sand.u32 1, %s1015_s30  }
 0x1d2   : > { %s699_s2 = scalar_lea.sflag [#allocation4], %s698_s0 }
 0x1d3   : > { %p898_p4 = pnand %p901_p6, %p1135_p8 }
 0x1d5   : > { %p899_p7 = pneg %p898_p4 }
 0x1d7   : > { %1010 = dma.done.wait (%p899_p7), %s699_s2, 128  }
 0x1d8   : > { %1012 = vsyncadd (%p899_p7), %s699_s2, 4294967168  ;;  %s23_s14 = sadd.s32 1, %s1035_s14   ;;  %s1275_s30 = smov %s1019_s10 }
 0x1d9   : > { %p20_p9 = scmp.ge.s32.totalorder %s23_s14, 4   ;;  %s1276_s10 = smov %s1023_s11 }
 0x1da   : > { %s1277_s11 = smov %s1141_s22  ;;  %s1278_s12 = smov %s1031_s13 }
 0x1db   : > { %s1279_s13 = smov %s1281_s17  ;;  %22 = sbr.rel (!%p20_p9) target bundleno = 9 (0x9), region = 112 }
 0x1e0   :  { %717 = vsyncpa [#allocation4], 1 }
 0x1e1   :  { %719 = vsyncpa [#allocation4 + $0x1], 1 }

</bundles_post_ra>
